<compile_context>
chip_gen: v5e
topology: v5e:2x2
jax: 0.10.0
libtpu: 0.0.40
codegen_flags: <defaults>
</compile_context>

<pallas_src>
import math
from functools import partial

import jax
import jax.numpy as jnp
import numpy as np
from jax.experimental import pallas as pl
from jax.experimental.pallas import tpu as pltpu


_LANE = 128
_SUBLANE_BY_ITEMSIZE = {4: 8, 2: 16, 1: 32}


# ---------------------------------------------------------------------------
# Pallas kernels
# ---------------------------------------------------------------------------
def _global_scale_kernel(x_ref, mean_ref, inv_ref, o_ref):
    # out = (x - mean) * (1 / (std * sqrt(D)))   -- inv precomputed on host
    o_ref[...] = ((x_ref[...] - mean_ref[...]) * inv_ref[...]).astype(o_ref.dtype)


def _per_species_scale_kernel(zk_ref, an_ref, x_ref, mean_ref, inv_ref, o_ref,
                              *, num_species):
    # Select-then-FMA form: build per-row (mean_sel, inv_sel) with a where
    # chain whose defaults (0, 1) make unmatched rows pass through unchanged
    # as (x - 0) * 1 == x, matching the torch masked in-place assignment.
    # The last matching species wins, same as the torch loop order.
    x = x_ref[...]                                   # (rows, D)
    an = an_ref[...]                                 # (rows, 1) int32
    mean_sel = jnp.zeros(x.shape, jnp.float32)
    inv_sel = jnp.ones(x.shape, jnp.float32)
    for s in range(num_species):                     # small & static
        m = an == zk_ref[s]                          # scalar z_key from SMEM
        mean_sel = jnp.where(m, mean_ref[pl.ds(s, 1), :], mean_sel)
        inv_sel = jnp.where(m, inv_ref[pl.ds(s, 1), :], inv_sel)
    o_ref[...] = ((x - mean_sel) * inv_sel).astype(o_ref.dtype)


# ---------------------------------------------------------------------------
# FeatureScaler wrapper (forward pass)
# ---------------------------------------------------------------------------
class FeatureScalerPallas:
    """JAX/Pallas equivalent of franken.rf.scaler.FeatureScaler forward pass."""

    def __init__(self, input_dim, mean, std, z_keys, scale_by_Z):
        self.input_dim = int(input_dim)
        self.scale_by_Z = bool(scale_by_Z)
        # reshape(-1, D) guards against 1-D (D,) global stats silently
        # mis-setting num_species (review correctness concern).
        mean = jnp.asarray(mean, jnp.float32).reshape(-1, self.input_dim)
        std = jnp.asarray(std, jnp.float32).reshape(-1, self.input_dim)
        self.num_species = int(mean.shape[0])
        # Fold the divide + 1/sqrt(D) into one precomputed reciprocal scale.
        # (std == 0 becomes inf here instead of at runtime; the reference has
        # no epsilon either.)
        inv = 1.0 / (std * math.sqrt(self.input_dim))                # (S, D)
        # Lane-pad the feature dim to a multiple of 128 once so every store is
        # an unmasked, lane-dense vst (biggest single lever on a store-bound
        # streaming kernel).  Padded mean=0 / inv=1 keep padded lanes inert;
        # the wrapper slices them off again.
        self.d_pad = -(-self.input_dim // _LANE) * _LANE
        pad = self.d_pad - self.input_dim
        self.mean = jnp.pad(mean, ((0, 0), (0, pad)))                 # (S, Dp)
        self.inv_scale = jnp.pad(inv, ((0, 0), (0, pad)), constant_values=1.0)
        self.z_keys = jnp.asarray(z_keys, jnp.int32).reshape(-1)      # (S,)

    # -- generation-aware tiling policy ------------------------------------
    @staticmethod
    def _chip_budget():
        """(vmem_limit_bytes, target_block_bytes, num_tensorcores) per chip gen."""
        vmem_cap = 64 * 1024 * 1024                  # conservative default (v7x TC)
        try:
            info = pltpu.get_tpu_info()
            vmem_cap = int(getattr(info, "vmem_capacity_bytes", vmem_cap))
        except Exception:
            pass
        if vmem_cap >= 100 * 1024 * 1024:
            # v5e / v6e: 128 MiB physical VMEM, single TensorCore per chip.
            return 64 * 1024 * 1024, 6 * 1024 * 1024, 1
        # v7x: 64 MiB VMEM per TensorCore, 2 TCs share the "parallel" grid axis.
        return 48 * 1024 * 1024, 4 * 1024 * 1024, 2

    def _auto_row_tile(self, n, itemsize, sub, per_species,
                       vmem_limit, target_block_bytes, num_tc):
        """Largest sublane-aligned row tile that fits the chip's VMEM budget."""
        d_pad = self.d_pad
        # rows from the per-block byte target on the streamed x block
        # (no max_rows cap: small-D cases now hit the full byte target).
        rows = max(sub, target_block_bytes // max(1, d_pad * itemsize))
        # VMEM backstop: double-buffered x + out (+ lane-padded atomic-number
        # column in the per-species path), resident stats, plus slack for a few
        # block-sized Mosaic-internal f32 temporaries.
        an_row = _LANE * 4 if per_species else 0
        resident = 2 * 2 * self.num_species * d_pad * 4
        per_row = 2 * (2 * d_pad * itemsize + an_row) + 3 * d_pad * 4
        fit = (int(0.85 * vmem_limit) - resident) // max(1, per_row)
        rows = min(rows, max(sub, int(fit)))
        # Multi-TensorCore chips: keep >= ~3 blocks per core so the "parallel"
        # axis feeds both cores AND leaves an i+1 block to prefetch into.
        # Single-TC chips (v5e/v6e) skip this — halving only adds grid steps.
        if num_tc > 1:
            cap = -(-n // (num_tc * 3))
            cap = -(-cap // sub) * sub
            rows = min(rows, max(sub, cap))
        # never bigger than the (sublane-rounded) problem itself
        n_up = -(-n // sub) * sub
        rows = min(rows, n_up)
        return max(sub, (rows // sub) * sub)

    # -- forward ------------------------------------------------------------
    def __call__(self, descriptors, atomic_numbers=None, *, row_tile=None):
        n, d = descriptors.shape
        assert d == self.input_dim
        itemsize = jnp.dtype(descriptors.dtype).itemsize
        sub = _SUBLANE_BY_ITEMSIZE.get(itemsize, 8)   # dtype-aware sublane multiple
        vmem_limit, target_block, num_tc = self._chip_budget()
        if row_tile is None:
            row_tile = self._auto_row_tile(n, itemsize, sub, self.scale_by_Z,
                                           vmem_limit, target_block, num_tc)
        row_tile = max(sub, (int(row_tile) // sub) * sub)

        d_pad = self.d_pad
        x = descriptors
        if d_pad != d:
            x = jnp.pad(x, ((0, 0), (0, d_pad - d)))

        # Uneven tail blocks are handled by Pallas with masked boundary stores,
        # so arbitrary n_atoms works with large tiles.
        grid = (pl.cdiv(n, row_tile),)
        cparams = pltpu.CompilerParams(
            dimension_semantics=("parallel",),
            vmem_limit_bytes=vmem_limit,
        )

        if not self.scale_by_Z:
            cost = pl.CostEstimate(
                flops=2 * n * d_pad,
                transcendentals=0,
                bytes_accessed=2 * n * d_pad * itemsize + 2 * d_pad * 4,
            )
            out = pl.pallas_call(
                _global_scale_kernel,
                out_shape=jax.ShapeDtypeStruct((n, d_pad), descriptors.dtype),
                grid_spec=pltpu.PrefetchScalarGridSpec(
                    num_scalar_prefetch=0,
                    grid=grid,
                    in_specs=[
                        pl.BlockSpec((row_tile, d_pad), lambda i: (i, 0)),
                        pl.BlockSpec((1, d_pad), lambda i: (0, 0)),   # mean (resident)
                        pl.BlockSpec((1, d_pad), lambda i: (0, 0)),   # inv_scale (resident)
                    ],
                    out_specs=pl.BlockSpec((row_tile, d_pad), lambda i: (i, 0)),
                ),
                compiler_params=cparams,
                cost_estimate=cost,
            )(x, self.mean[:1], self.inv_scale[:1])
            return out if d_pad == d else out[:, :d]

        assert atomic_numbers is not None, "atomic_numbers required when scaling by Z"
        an_col = atomic_numbers.astype(jnp.int32).reshape(n, 1)
        s = self.num_species
        kernel = partial(_per_species_scale_kernel, num_species=s)
        cost = pl.CostEstimate(
            flops=(2 * s + 2) * n * d_pad,
            transcendentals=0,
            bytes_accessed=2 * n * d_pad * itemsize + n * 4 + 2 * s * d_pad * 4,
        )
        # TODO(synk): the (row_tile, 1) atomic-number column is a narrow strided
        # DMA; if a trace shows it exposed, ship atomic numbers lane-dense and
        # relayout on the (idle) XLU in-kernel instead.
        out = pl.pallas_call(
            kernel,
            out_shape=jax.ShapeDtypeStruct((n, d_pad), descriptors.dtype),
            grid_spec=pltpu.PrefetchScalarGridSpec(
                num_scalar_prefetch=1,                 # z_keys -> SMEM
                grid=grid,
                in_specs=[
                    pl.BlockSpec((row_tile, 1), lambda i, zk: (i, 0)),      # atomic numbers
                    pl.BlockSpec((row_tile, d_pad), lambda i, zk: (i, 0)),  # descriptors
                    pl.BlockSpec((s, d_pad), lambda i, zk: (0, 0)),         # mean (resident)
                    pl.BlockSpec((s, d_pad), lambda i, zk: (0, 0)),         # inv_scale (resident)
                ],
                out_specs=pl.BlockSpec((row_tile, d_pad), lambda i, zk: (i, 0)),
            ),
            compiler_params=cparams,
            cost_estimate=cost,
        )(self.z_keys, an_col, x, self.mean, self.inv_scale)
        return out if d_pad == d else out[:, :d]


# ---------------------------------------------------------------------------
# Pure-JAX reference (mirrors the torch forward exactly)
# ---------------------------------------------------------------------------
def reference_forward(descriptors, atomic_numbers, mean, std, z_keys,
                      scale_by_Z, input_dim):
    sqrt_d = math.sqrt(input_dim)
    if not scale_by_Z:
        return (descriptors - mean) / (std * sqrt_d)
    out = descriptors
    for idx in range(z_keys.shape[0]):
        m = (atomic_numbers == z_keys[idx])[:, None]
        out = jnp.where(m, (descriptors - mean[idx]) / (std[idx] * sqrt_d), out)
    return out


def _make_inputs(key, n_atoms, input_dim, num_species):
    k1, k2, k3, k4 = jax.random.split(key, 4)
    descriptors = jax.random.normal(k1, (n_atoms, input_dim), jnp.float32)
    mean = jax.random.normal(k2, (num_species, input_dim), jnp.float32)
    std = jnp.abs(jax.random.normal(k3, (num_species, input_dim), jnp.float32)) + 0.5
    z_keys = jnp.array([1, 6, 8], jnp.int32)[:num_species]
    # mostly in z_keys, a few unmatched (Z=2) rows exercise the pass-through path
    atomic_numbers = jax.random.choice(
        k4, jnp.array([1, 6, 8, 2], jnp.int32), shape=(n_atoms,))
    return descriptors, atomic_numbers, mean, std, z_keys


if __name__ == "__main__":
    key = jax.random.PRNGKey(0)

    # ---- per-species (scale_by_Z=True), D a multiple of 128 ----
    n_atoms, input_dim, num_species = 20, 256, 3
    descriptors, atomic_numbers, mean, std, z_keys = _make_inputs(
        key, n_atoms, input_dim, num_species)
    scaler_z = FeatureScalerPallas(input_dim, mean, std, z_keys, scale_by_Z=True)
    out_z = jax.block_until_ready(scaler_z(descriptors, atomic_numbers))
    ref_z = reference_forward(descriptors, atomic_numbers, mean, std, z_keys,
                              True, input_dim)
    np.testing.assert_allclose(np.asarray(out_z), np.asarray(ref_z),
                               rtol=1e-5, atol=1e-5)

    # ---- per-species with D NOT a multiple of 128 (exercises lane padding) ----
    n2, d2 = 37, 200
    descr2, an2, mean2, std2, zk2 = _make_inputs(jax.random.PRNGKey(1), n2, d2,
                                                 num_species)
    scaler_p = FeatureScalerPallas(d2, mean2, std2, zk2, scale_by_Z=True)
    out_p = jax.block_until_ready(scaler_p(descr2, an2))
    ref_p = reference_forward(descr2, an2, mean2, std2, zk2, True, d2)
    np.testing.assert_allclose(np.asarray(out_p), np.asarray(ref_p),
                               rtol=1e-5, atol=1e-5)

    # ---- global (scale_by_Z=False) ----
    g_mean = mean[:1]
    g_std = std[:1]
    scaler_g = FeatureScalerPallas(input_dim, g_mean, g_std,
                                   jnp.zeros((1,), jnp.int32), scale_by_Z=False)
    out_g = jax.block_until_ready(scaler_g(descriptors))
    ref_g = reference_forward(descriptors, atomic_numbers, g_mean, g_std,
                              jnp.zeros((1,), jnp.int32), False, input_dim)
    np.testing.assert_allclose(np.asarray(out_g), np.asarray(ref_g),
                               rtol=1e-5, atol=1e-5)

    print("KERNEL_OK")
</pallas_src>

<mosaic_0001>
module attributes {stable_mosaic.version = 11 : i64} {
  func.func @_per_species_scale_kernel(%arg0: i32, %arg1: memref<3xi32, #tpu.memory_space<smem>>, %arg2: memref<8x1xi32, #tpu.memory_space<vmem>>, %arg3: memref<8x256xf32, #tpu.memory_space<vmem>>, %arg4: memref<3x256xf32, #tpu.memory_space<vmem>>, %arg5: memref<3x256xf32, #tpu.memory_space<vmem>>, %arg6: memref<8x256xf32, #tpu.memory_space<vmem>>) attributes {dimension_semantics = [#tpu.dimension_semantics<parallel>], iteration_bounds = array<i64: 3>, scalar_prefetch = 1 : i64, scratch_operands = 0 : i64, tpu.core_type = #tpu.core_type<tc>, window_params = [{transform_indices = @transform_0, window_bounds = array<i64: 8, 1>}, {transform_indices = @transform_1, window_bounds = array<i64: 8, 256>}, {pipeline_mode = #tpu.pipeline_mode<synchronous>, transform_indices = @transform_2, window_bounds = array<i64: 3, 256>}, {pipeline_mode = #tpu.pipeline_mode<synchronous>, transform_indices = @transform_3, window_bounds = array<i64: 3, 256>}, {transform_indices = @transform_4, window_bounds = array<i64: 8, 256>}]} {
    %c0 = arith.constant 0 : index
    %c0_0 = arith.constant 0 : index
    %0 = vector.load %arg3[%c0, %c0_0] : memref<8x256xf32, #tpu.memory_space<vmem>>, vector<8x256xf32>
    %c0_1 = arith.constant 0 : index
    %c0_2 = arith.constant 0 : index
    %1 = vector.load %arg2[%c0_1, %c0_2] : memref<8x1xi32, #tpu.memory_space<vmem>>, vector<8x1xi32>
    %cst = arith.constant 0.000000e+00 : f32
    %2 = vector.broadcast %cst : f32 to vector<8x256xf32>
    %cst_3 = arith.constant 1.000000e+00 : f32
    %3 = vector.broadcast %cst_3 : f32 to vector<8x256xf32>
    %c0_4 = arith.constant 0 : index
    %4 = memref.load %arg1[%c0_4] : memref<3xi32, #tpu.memory_space<smem>>
    %5 = vector.broadcast %4 : i32 to vector<8x1xi32>
    %6 = arith.cmpi eq, %1, %5 : vector<8x1xi32>
    %c0_5 = arith.constant 0 : index
    %c0_6 = arith.constant 0 : index
    %7 = vector.load %arg4[%c0_5, %c0_6] : memref<3x256xf32, #tpu.memory_space<vmem>>, vector<1x256xf32>
    %8 = vector.shape_cast %6 : vector<8x1xi1> to vector<8x1xi1>
    %9 = vector.broadcast %8 : vector<8x1xi1> to vector<8x256xi1>
    %10 = vector.shape_cast %7 : vector<1x256xf32> to vector<1x256xf32>
    %11 = vector.broadcast %10 : vector<1x256xf32> to vector<8x256xf32>
    %12 = arith.select %9, %11, %2 : vector<8x256xi1>, vector<8x256xf32>
    %c0_7 = arith.constant 0 : index
    %c0_8 = arith.constant 0 : index
    %13 = vector.load %arg5[%c0_7, %c0_8] : memref<3x256xf32, #tpu.memory_space<vmem>>, vector<1x256xf32>
    %14 = vector.shape_cast %6 : vector<8x1xi1> to vector<8x1xi1>
    %15 = vector.broadcast %14 : vector<8x1xi1> to vector<8x256xi1>
    %16 = vector.shape_cast %13 : vector<1x256xf32> to vector<1x256xf32>
    %17 = vector.broadcast %16 : vector<1x256xf32> to vector<8x256xf32>
    %18 = arith.select %15, %17, %3 : vector<8x256xi1>, vector<8x256xf32>
    %c1 = arith.constant 1 : index
    %19 = memref.load %arg1[%c1] : memref<3xi32, #tpu.memory_space<smem>>
    %20 = vector.broadcast %19 : i32 to vector<8x1xi32>
    %21 = arith.cmpi eq, %1, %20 : vector<8x1xi32>
    %c1_9 = arith.constant 1 : index
    %c0_10 = arith.constant 0 : index
    %22 = vector.load %arg4[%c1_9, %c0_10] : memref<3x256xf32, #tpu.memory_space<vmem>>, vector<1x256xf32>
    %23 = vector.shape_cast %21 : vector<8x1xi1> to vector<8x1xi1>
    %24 = vector.broadcast %23 : vector<8x1xi1> to vector<8x256xi1>
    %25 = vector.shape_cast %22 : vector<1x256xf32> to vector<1x256xf32>
    %26 = vector.broadcast %25 : vector<1x256xf32> to vector<8x256xf32>
    %27 = arith.select %24, %26, %12 : vector<8x256xi1>, vector<8x256xf32>
    %c1_11 = arith.constant 1 : index
    %c0_12 = arith.constant 0 : index
    %28 = vector.load %arg5[%c1_11, %c0_12] : memref<3x256xf32, #tpu.memory_space<vmem>>, vector<1x256xf32>
    %29 = vector.shape_cast %21 : vector<8x1xi1> to vector<8x1xi1>
    %30 = vector.broadcast %29 : vector<8x1xi1> to vector<8x256xi1>
    %31 = vector.shape_cast %28 : vector<1x256xf32> to vector<1x256xf32>
    %32 = vector.broadcast %31 : vector<1x256xf32> to vector<8x256xf32>
    %33 = arith.select %30, %32, %18 : vector<8x256xi1>, vector<8x256xf32>
    %c2 = arith.constant 2 : index
    %34 = memref.load %arg1[%c2] : memref<3xi32, #tpu.memory_space<smem>>
    %35 = vector.broadcast %34 : i32 to vector<8x1xi32>
    %36 = arith.cmpi eq, %1, %35 : vector<8x1xi32>
    %c2_13 = arith.constant 2 : index
    %c0_14 = arith.constant 0 : index
    %37 = vector.load %arg4[%c2_13, %c0_14] : memref<3x256xf32, #tpu.memory_space<vmem>>, vector<1x256xf32>
    %38 = vector.shape_cast %36 : vector<8x1xi1> to vector<8x1xi1>
    %39 = vector.broadcast %38 : vector<8x1xi1> to vector<8x256xi1>
    %40 = vector.shape_cast %37 : vector<1x256xf32> to vector<1x256xf32>
    %41 = vector.broadcast %40 : vector<1x256xf32> to vector<8x256xf32>
    %42 = arith.select %39, %41, %27 : vector<8x256xi1>, vector<8x256xf32>
    %c2_15 = arith.constant 2 : index
    %c0_16 = arith.constant 0 : index
    %43 = vector.load %arg5[%c2_15, %c0_16] : memref<3x256xf32, #tpu.memory_space<vmem>>, vector<1x256xf32>
    %44 = vector.shape_cast %36 : vector<8x1xi1> to vector<8x1xi1>
    %45 = vector.broadcast %44 : vector<8x1xi1> to vector<8x256xi1>
    %46 = vector.shape_cast %43 : vector<1x256xf32> to vector<1x256xf32>
    %47 = vector.broadcast %46 : vector<1x256xf32> to vector<8x256xf32>
    %48 = arith.select %45, %47, %33 : vector<8x256xi1>, vector<8x256xf32>
    %49 = arith.subf %0, %42 : vector<8x256xf32>
    %50 = arith.mulf %49, %48 : vector<8x256xf32>
    %c0_17 = arith.constant 0 : index
    %c0_18 = arith.constant 0 : index
    %51 = vector.load %arg6[%c0_17, %c0_18] : memref<8x256xf32, #tpu.memory_space<vmem>>, vector<8x256xf32>
    tpu.vector_store %arg6[%c0_17, %c0_18], %50 {strides = array<i32>} : memref<8x256xf32, #tpu.memory_space<vmem>>, vector<8x256xf32>,
    return
  }
  func.func @transform_0(%arg0: i32, %arg1: memref<3xi32, #tpu.memory_space<smem>>) -> (i32, i32) {
    %c0_i32 = arith.constant 0 : i32
    %c0_i32_0 = arith.constant 0 : i32
    return %arg0, %c0_i32 : i32, i32
  }
  func.func @transform_1(%arg0: i32, %arg1: memref<3xi32, #tpu.memory_space<smem>>) -> (i32, i32) {
    %c0_i32 = arith.constant 0 : i32
    %c0_i32_0 = arith.constant 0 : i32
    return %arg0, %c0_i32 : i32, i32
  }
  func.func @transform_2(%arg0: i32, %arg1: memref<3xi32, #tpu.memory_space<smem>>) -> (i32, i32) {
    %c0_i32 = arith.constant 0 : i32
    %c0_i32_0 = arith.constant 0 : i32
    %c0_i32_1 = arith.constant 0 : i32
    return %c0_i32, %c0_i32_0 : i32, i32
  }
  func.func @transform_3(%arg0: i32, %arg1: memref<3xi32, #tpu.memory_space<smem>>) -> (i32, i32) {
    %c0_i32 = arith.constant 0 : i32
    %c0_i32_0 = arith.constant 0 : i32
    %c0_i32_1 = arith.constant 0 : i32
    return %c0_i32, %c0_i32_0 : i32, i32
  }
  func.func @transform_4(%arg0: i32, %arg1: memref<3xi32, #tpu.memory_space<smem>>) -> (i32, i32) {
    %c0_i32 = arith.constant 0 : i32
    %c0_i32_0 = arith.constant 0 : i32
    return %arg0, %c0_i32 : i32, i32
  }
}

</mosaic_0001>

<bundles_post_ra>
// kernel: tpu_custom_call.1
= control target key start
LH: loop header
LB: loop body
LE: loop exit
PB: predicated region body
PF: predicated region fallthrough
CT: control target
= control target key end

     0   :  { %s611_s21 = smov [#allocation3]   ;;  %s810_s0 = inlined_call_operand.vmem [shape: s32[3], index: 0, kind: input, shape index: {}]   ;;  %s811_s1 = inlined_call_operand.vmem [shape: s32[20,1], index: 1, kind: input, shape index: {}]   ;;  %s812_s2 = inlined_call_operand.hbm [shape: f32[20,256], index: 2, kind: input, shape index: {}]   ;;  %s813_s3 = inlined_call_operand.vmem [shape: f32[3,256], index: 3, kind: input, shape index: {}]   ;;  %s814_s4 = inlined_call_operand.vmem [shape: f32[3,256], index: 4, kind: input, shape index: {}]   ;;  %s815_s5 = inlined_call_operand.hbm [shape: f32[20,256], index: 5, kind: output, shape index: {}]  }
   0x1   :  { %s11_s20 = sshll.u32 %s810_s0, 4  ;;  %s12_s20 = int_to_ptr.vmem [resolvable:$true] %s11_s20 }
   0x2   :  { %14 = dma.vmem_to_smem %s12_s20, 16, %s611_s21, [#allocation2] }
   0x3   :  { %585 = dma.done.wait [#allocation2], 16 }
   0x4   :  { %586 = vsyncadd [#allocation2], 4294967280 }
   0x5   :  { %17 = sfence }
   0x6   :  { %18 = vsyncpa [#allocation5], 0 }
   0x7   :  { %20 = vsyncpa [#allocation5 + $0x1], 0 }
   0x8   :  { %21 = vsyncpa [#allocation6], 0 }
   0x9   :  { %23 = vsyncpa [#allocation6 + $0x1], 0  ;;  %s646_s22 = smov 0   ;;  %s648_s23 = smov 0  }
   0xa   :  { %s650_s24 = smov 0   ;;  %s652_s25 = smov 0  }
   0xb LB: > { %s667_s0 = sadd.s32 4294967295, %s609_s25   ;;  %s426_s26 = sadd.s32 4294967294, %s609_s25   ;;  %s609_s25 = sphi %s652_s25, %s824_s25   ;;  %s605_s24 = sphi %s650_s24, %s823_s24   ;;  %s601_s23 = sphi %s648_s23, %s822_s23   ;;  %s597_s22 = sphi %s646_s22, %s821_s22  }
   0xc   : > { %s671_s27 = sadd.s32 1, %s609_s25   ;;  %s62_s28 = sadd.s32 1, %s605_s24 }
   0xd   : > { %s59_s29 = ssub.s32 %s609_s25, %s671_s27  ;;  %p69_p0 = scmp.ne.s32.totalorder %s605_s24, %s601_s23 }
   0xe   : > { %p60_p1 = scmp.eq.s32.totalorder %s59_s29, 0  ;;  %p70_p2 = scmp.eq.s32.totalorder %s609_s25, 0 }
   0xf   : > { %p75_p3 = scmp.ne.s32.totalorder %s601_s23, %s597_s22  ;;  %p76_p4 = scmp.eq.s32.totalorder %s667_s0, 0 }
  0x10   : > { %s683_s30 = scalar_select %p60_p1, %s605_s24, %s62_s28  }
  0x11   : > { %p685_p5 = por %p70_p2, %p69_p0  ;;  %p689_p6 = por %p76_p4, %p75_p3 }
  0x12   : > { %p141_p7 = scmp.eq.s32.totalorder %s667_s0, 2  ;;  %p147_p8 = scmp.eq.s32.totalorder %s426_s26, 2 }
  0x13   : > { %p461_p9 = scmp.lt.s32.totalorder %s609_s25, 3  ;;  %s180_s10 = sand.u32 1, %s605_s24  }
  0x14   : > { %p695_p10 = por %p141_p7, %p69_p0  ;;  %p699_p11 = por %p147_p8, %p75_p3 }
  0x15   : > { %s447_s11 = sshll.u32 %s609_s25, 4  ;;  %s429_s12 = sshll.u32 %s180_s10, 4 }
  0x16   : > { %s189_s15 = scalar_lea.hbm %s812_s2, %s447_s11  ;;  %s184_s17 = scalar_lea.vmem [#allocation4], %s429_s12 }
  0x17   : > { %s191_s16 = sshll.u32 %s189_s15, 4  ;;  %s193_s18 = sshll.u32 %s184_s17, 4  ;;  %s192_s16 = int_to_ptr.hbm [resolvable:$true] %s191_s16  ;;  %s194_s18 = int_to_ptr.vmem [resolvable:$true] %s193_s18 }
  0x18   : > { %p710_p12 = pnand %p461_p9, %p685_p5  ;;  %p432_p13 = scmp.ge.s32.totalorder %s609_s25, 1 }
  0x19   : > { %p198_p0 = scmp.lt.s32.totalorder %s609_s25, 4  ;;  %s181_s20 = scalar_lea.sflag [#allocation5], %s180_s10 }
  0x1a   : > { %s511_s21 = sshra.s32 %s192_s16, 4  ;;  %p515_p2 = pneg %p710_p12  ;;  %s512_s21 = int_to_ptr.hbm [resolvable:$true] %s511_s21 }
  0x1b   : > { %s513_s26 = scalar_lea.hbm %s512_s21, 16  ;;  %s518_s6 = scalar_lea.hbm %s812_s2, 48 }
  0x1c   : > { %p514_p1 = scmp.ne.s32.totalorder %s512_s21, %s513_s26  ;;  %p519_p5 = scmp.lt.s32.totalorder %s512_s21, %s812_s2 }
  0x1d   : > { %p520_p7 = scmp.lt.s32.totalorder %s518_s6, %s513_s26 }
  0x1e   : > { %p516_p3 = pnand %p515_p2, %p514_p1 }
  0x1f   : > { %p521_p8 = por %p520_p7, %p519_p5 }
  0x20   : > { %p517_p4 = pneg %p516_p3 }
  0x22   : > { %p522_p9 = pnand %p521_p8, %p517_p4 }
  0x24   : > { %525 = shalt.err (!%p522_p9)
}
  0x25   : > { %456 = dma.hbm_to_vmem [thread:$0]  (!%p710_p12), %s192_s16, 256, %s194_s18, %s181_s20  }
  0x26   : > { %p199_p1 = pnand %p432_p13, %p198_p0 }
  0x27   : > { %s731_s10 = sand.u32 (!%p199_p1), 1, %s601_s23  }
  0x28   : > { %202 = sbr.rel (%p199_p1) target bundleno = 189 (0xbd), region = 36  ;;  %s433_s13 = sshll.u32 (!%p199_p1), %s731_s10, 4 }
  0x29   : > { %s205_s14 = scalar_lea.sflag (!%p199_p1), [#allocation5], %s731_s10  ;;  %s737_s15 = scalar_lea.vmem (!%p199_p1), [#allocation4], %s433_s13 }
  0x2d   : > { %588 = dma.done.wait (%p689_p6), %s205_s14, 256  }
  0x2e   : > { %590 = vsyncadd (%p689_p6), %s205_s14, 4294967040  ;;  %p238_p12 = scmp.lt.s32.totalorder %s667_s0, 2  ;;  %v612_v0 = vmov 0   ;;  %s245_s16 = sld [smem:[#allocation3]]  ;;  %v242_v33 = vld [vmem:[%s737_s15] sm:$0xff]  ;;  %v243_v34 = vld [vmem:[%s737_s15 + $0x8] sm:$0xff] }
  0x2f   : > { %497 = vset.pattern.permute.xlu0 %v612_v0  ;;  %498 = vset.pattern.permute.xlu1 %v612_v0  ;;  %s436_s18 = sld [smem:[#allocation3 + $0x1]]  ;;  %v248_v9 = vld [vmem:[%s813_s3] ss:$4 sm:$0x3]  ;;  %s448_s26 = sshll.u32 %s667_s0, 4 }
  0x30   : > { %s239_s17 = scalar_select %p238_p12, %s667_s0, 2  ;;  %v261_v10 = vld [vmem:[%s814_s4] ss:$4 sm:$0x3]  ;;  %v255_v13 = vperm.slane %v248_v9, 0  ;;  %v256_v14 = vperm.slane %v248_v9, 1 }
  0x31   : > { %s439_s20 = sld [smem:[#allocation3 + $0x2]]  ;;  %v437_v11 = vld [vmem:[%s813_s3 + $0x1] ss:$4 sm:$0x3]  ;;  %v263_v16 = vperm.slane %v261_v10, 0  ;;  %v264_v17 = vperm.slane %v261_v10, 1  ;;  %s339_s7 = scalar_lea.hbm %s815_s5, %s448_s26 }
  0x32   : > { %s435_s19 = sshll.u32 %s239_s17, 3  ;;  %v438_v12 = vld [vmem:[%s814_s4 + $0x1] ss:$4 sm:$0x3]  ;;  %v280_v20 = vperm.slane %v437_v11, 0  ;;  %v281_v21 = vperm.slane %v437_v11, 1 }
  0x33   : > { %s241_s28 = scalar_lea.vmem %s811_s1, %s435_s19  ;;  %v440_v15 = vld [vmem:[%s813_s3 + $0x2] ss:$4 sm:$0x3]  ;;  %v289_v22 = vperm.slane %v438_v12, 0  ;;  %v290_v23 = vperm.slane %v438_v12, 1  ;;  %s237_s29 = scalar_lea.vmem [#allocation7], %s433_s13 }
  0x34   : > { %v244_v1 = vld [vmem:[%s241_s28] sm:$0xff]  ;;  %v246_v2 = vstv %s245_s16  ;;  %v306_v24 = vperm.slane %v440_v15, 0  ;;  %v307_v25 = vperm.slane %v440_v15, 1  ;;  %s341_s6 = sshll.u32 %s237_s29, 4  ;;  %s343_s15 = sshll.u32 %s339_s7, 4  ;;  %s342_s6 = int_to_ptr.vmem [resolvable:$true] %s341_s6  ;;  %s344_s15 = int_to_ptr.hbm [resolvable:$true] %s343_s15 }
  0x35   : > { %vm247_vm0 = vcmp.eq.s32.totalorder %v244_v1, %v246_v2  ;;  %v270_v4 = vstv %s436_s18  ;;  %v441_v18 = vld [vmem:[%s814_s4 + $0x2] ss:$4 sm:$0x3]  ;;  %s328_s11 = scalar_lea.sflag [#allocation6], %s731_s10  ;;  %s555_s12 = sshra.s32 %s344_s15, 4  ;;  %s556_s12 = int_to_ptr.hbm [resolvable:$true] %s555_s12 }
  0x36   : > { %v249_v3 = vsel %vm247_vm0, 1, %v612_v0  ;;  %vm271_vm2 = vcmp.eq.s32.totalorder %v244_v1, %v270_v4  ;;  %v315_v28 = vperm.slane %v441_v18, 0  ;;  %v316_v29 = vperm.slane %v441_v18, 1  ;;  %s557_s14 = scalar_lea.hbm %s556_s12, 16  ;;  %s561_s17 = scalar_lea.hbm %s815_s5, 48 }
  0x37   : > { %251 = vperm.xlu0 %497, %v249_v3   ;;  %v296_v5 = vstv %s439_s20  ;;  %v274_v7 = vsel %vm271_vm2, 1, %v612_v0  ;;  %p558_p6 = scmp.ne.s32.totalorder %s556_s12, %s557_s14  ;;  %p562_p2 = scmp.lt.s32.totalorder %s556_s12, %s815_s5 }
  0x38   : > { %vm297_vm1 = vcmp.eq.s32.totalorder %v244_v1, %v296_v5  ;;  %p563_p3 = scmp.lt.s32.totalorder %s561_s17, %s557_s14 }
  0x39   : > { %v300_v6 = vsel %vm297_vm1, 1, %v612_v0  ;;  %p559_p13 = pnand %p558_p6, %p695_p10 }
  0x3a   : > { %302 = vperm.xlu1 %498, %v300_v6   ;;  %p564_p4 = por %p563_p3, %p562_p2 }
  0x3b   : > { %p560_p0 = pneg %p559_p13 }
  0x3d   : > { %p565_p5 = pnand %p564_p4, %p560_p0 }
  0x3f   : > { %276 = vperm.xlu0 %497, %v274_v7  }
  0xa9   : > { %v252_v8 = vpop.permute.xlu0 %251 }
  0xaa   : > { %vm253_vm3 = vcmp.eq.s32.totalorder %v252_v8, 1 }
  0xab   : > { %v259_v26 = vsel %vm253_vm3, %v255_v13, 0.0  ;;  %v260_v30 = vsel %vm253_vm3, %v256_v14, 0.0  ;;  %v267_v31 = vsel %vm253_vm3, %v263_v16, 1.0  ;;  %v268_v32 = vsel %vm253_vm3, %v264_v17, 1.0 }
  0xac   : > { %v303_v19 = vpop.permute.xlu1 %302 }
  0xad   : > { %vm304_vm4 = vcmp.eq.s32.totalorder %v303_v19, 1 }
  0xb1   : > { %v277_v27 = vpop.permute.xlu0 %276 }
  0xb2   : > { %vm278_vm5 = vcmp.eq.s32.totalorder %v277_v27, 1 }
  0xb3   : > { %v284_v35 = vsel %vm278_vm5, %v280_v20, %v259_v26  ;;  %v285_v36 = vsel %vm278_vm5, %v281_v21, %v260_v30  ;;  %v293_v37 = vsel %vm278_vm5, %v289_v22, %v267_v31  ;;  %v294_v38 = vsel %vm278_vm5, %v290_v23, %v268_v32 }
  0xb4   : > { %v310_v39 = vsel %vm304_vm4, %v306_v24, %v284_v35  ;;  %v311_v40 = vsel %vm304_vm4, %v307_v25, %v285_v36  ;;  %v319_v43 = vsel %vm304_vm4, %v315_v28, %v293_v37  ;;  %v320_v44 = vsel %vm304_vm4, %v316_v29, %v294_v38 }
  0xb5   : > { %v321_v41 = vsub.f32 %v242_v33, %v310_v39  ;;  %v322_v42 = vsub.f32 %v243_v34, %v311_v40 }
  0xb7   : > { %v323_v45 = vmul.f32 %v321_v41, %v319_v43  ;;  %v324_v46 = vmul.f32 %v322_v42, %v320_v44 }
  0xb9   : > { %325 = vst [vmem:[%s237_s29] sm:$0xff] %v323_v45 }
  0xba   : > { %326 = vst [vmem:[%s237_s29 + $0x8] sm:$0xff] %v324_v46 }
  0xbb   : > { %568 = shalt.err (!%p565_p5)
}
  0xbc   : > { %451 = dma.vmem_to_hbm [thread:$0]  (%p695_p10), %s342_s6, 256, %s344_s15, %s328_s11  }
  0xbd PF: > { %p462_p7 = scmp.ge.s32.totalorder %s609_s25, 2  ;;  %s355_s10 = sand.u32 1, %s597_s22  }
  0xbe   : > { %s356_s20 = scalar_lea.sflag [#allocation6], %s355_s10 }
  0xbf   : > { %p458_p8 = pnand %p462_p7, %p699_p11 }
  0xc1   : > { %p459_p9 = pneg %p458_p8 }
  0xc3   : > { %592 = dma.done.wait (%p459_p9), %s356_s20, 256  }
  0xc4   : > { %594 = vsyncadd (%p459_p9), %s356_s20, 4294967040  ;;  %p26_p1 = scmp.ge.s32.totalorder %s671_s27, 5   ;;  %s821_s22 = smov %s601_s23 }
  0xc5   : > { %s822_s23 = smov %s605_s24  ;;  %s823_s24 = smov %s683_s30 }
  0xc6   : > { %s824_s25 = smov %s671_s27  ;;  %28 = sbr.rel (!%p26_p1) target bundleno = 11 (0xb), region = 88 }
  0xcb   :  { %362 = vsyncpa [#allocation5], 1 }
  0xcc   :  { %364 = vsyncpa [#allocation5 + $0x1], 1 }
  0xcd   :  { %365 = vsyncpa [#allocation6], 1 }
  0xce   :  { %367 = vsyncpa [#allocation6 + $0x1], 1 }

</bundles_post_ra>
